<compile_context>
chip_gen: v7x
topology: tpu7x:2x2x1
jax: 0.10.0
libtpu: 0.0.40
codegen_flags: <defaults>
</compile_context>

<pallas_src>
import functools
import math

import jax
import jax.numpy as jnp
from jax.experimental import pallas as pl
from jax.experimental.pallas import tpu as pltpu

# pointcam uses a small fp16-safe epsilon for the reciprocal.
EPSILON_FP16 = 1e-4

# Per input buffer (x2 for double buffering).  8 MiB amortizes per-step
# overhead on all generations and the total footprint (~24 MiB with headroom)
# fits v7x's 64 MiB physical VMEM without chasing v6e-sized budgets.
_TILE_BYTES = 8 << 20
# Lane-axis tile when the patch axis must be split (only for huge n_patches).
# Multiple of 128; 64 KiB+ contiguous HBM segments at f32.
_PATCH_TILE_MAX = 16384


def _sparsity_loss_kernel(x_ref, o_ref, acc_ref, *, n_patches, patch_tile,
                          patch_chunks, scale, inv_batch, emit_scalar):
    """x_ref: (row_tile, patch_tile) tile of the (n_masks*batch, n_patches) view."""

    def _emit(row_sum):
        # row_sum: (row_tile, 1) f32 = sum over all (valid) patches per row.
        probs = row_sum * jnp.float32(1.0 / n_patches)
        denom = jnp.sin(probs * jnp.float32(math.pi)) + jnp.float32(EPSILON_FP16)
        # Exact division: the approx reciprocal (~1e-3 rel err) is too coarse
        # when denom ~ EPSILON_FP16 near probs ~ 0 or 1.
        loss = (1.0 / denom - 1.0) * jnp.float32(scale)
        if emit_scalar:
            # Single row chunk -> no padded rows in this block, so fusing the
            # final sum(masks)/batch here is exact and removes a trailing
            # launch-overhead-dominated XLA reduction.
            o_ref[...] = jnp.sum(loss, axis=0, keepdims=True) * jnp.float32(inv_batch)
        else:
            # Padded rows (if any) hold garbage but are clipped on writeback.
            # TODO(synk): for very large rows (~1e5+) emit a lane-dense
            # (1, row_tile) output block instead of (row_tile, 1) to avoid
            # masked vst.msk stores / narrow writeback DMAs.
            o_ref[...] = loss.astype(o_ref.dtype)

    if patch_chunks == 1:
        # Whole patch axis in one tile: the lane reduce IS the finalize.
        x = x_ref[...].astype(jnp.float32)  # per-tile cast keeps HBM at native width
        _emit(jnp.sum(x, axis=-1, keepdims=True))
        return

    # ---- patch axis split across the (last, "arbitrary") grid dimension ----
    j = pl.program_id(1)
    last = pl.num_programs(1) - 1

    def _lane_fold(v):
        # (row_tile, patch_tile) -> (row_tile, 128) with plain per-vreg VALU
        # adds: no XLU ports used in the steady state (matters for bf16 on v7x).
        out = v[:, 0:128]
        for c in range(1, patch_tile // 128):
            out = out + v[:, c * 128:(c + 1) * 128]
        return out

    @pl.when(j == 0)
    def _init():
        acc_ref[...] = jnp.zeros_like(acc_ref)

    x = x_ref[...].astype(jnp.float32)

    if n_patches % patch_tile != 0:
        # Remainder-lane masking gated onto the last chunk only; the hot path
        # is an unmasked accumulate (no compare/select per element per chunk).
        @pl.when(j != last)
        def _hot():
            acc_ref[...] += _lane_fold(x)

        @pl.when(j == last)
        def _tail():
            col = jax.lax.broadcasted_iota(jnp.int32, x.shape, 1)
            xm = jnp.where(j * patch_tile + col < n_patches, x, 0.0)
            acc_ref[...] += _lane_fold(xm)
    else:
        acc_ref[...] += _lane_fold(x)

    @pl.when(j == last)
    def _finalize():
        # Single cross-lane (XLU) reduce + transcendentals, once per row tile.
        _emit(jnp.sum(acc_ref[...], axis=-1, keepdims=True))


def sparsity_loss(masks: jax.Array, n_masks: int, beta: float = 1.5, *,
                  tile_bytes: int = _TILE_BYTES,
                  patch_tile_max: int = _PATCH_TILE_MAX) -> jax.Array:
    """masks: (n_masks, batch, n_patches, 1) -> scalar float32 loss."""
    assert masks.ndim == 4 and masks.shape[0] == n_masks and masks.shape[-1] == 1
    assert patch_tile_max % 128 == 0
    n, b, p, _ = masks.shape
    rows = n * b

    # Layout-preserving reshape (squeeze trailing 1, fold n*b): no data movement.
    x = masks.reshape(rows, p)

    itemsize = jnp.dtype(x.dtype).itemsize
    row_align = max(8, 32 // itemsize)        # 8 for f32, 16 for bf16, 32 for int8

    # Patch (lane) tile: keep the whole axis (fully contiguous HBM reads)
    # unless it is absurdly long, then split in 128-lane multiples.
    patch_tile = p if p <= patch_tile_max else patch_tile_max
    patch_chunks = pl.cdiv(p, patch_tile)
    if patch_chunks > 1:
        assert patch_tile % 128 == 0

    # Row (sublane) tile: give the rest of the per-buffer byte budget to rows.
    max_rows = max(row_align,
                   (tile_bytes // (patch_tile * itemsize)) // row_align * row_align)
    row_tile = rows if rows <= max_rows else max_rows
    grid_rows = pl.cdiv(rows, row_tile)
    grid = (grid_rows, patch_chunks)          # reduction (patch) axis last

    # Common case: rows = n_masks*batch is small -> one row chunk -> the kernel
    # emits the final scalar directly.
    emit_scalar = grid_rows == 1

    scale = math.sin(math.pi * (n_masks ** (-beta)))

    kernel = functools.partial(
        _sparsity_loss_kernel, n_patches=p, patch_tile=patch_tile,
        patch_chunks=patch_chunks, scale=scale, inv_batch=1.0 / b,
        emit_scalar=emit_scalar)

    # f32 accumulator scratch; only really used when the patch axis is split
    # (a tiny dummy otherwise so the kernel signature stays fixed).
    acc_rows = row_tile if patch_chunks > 1 else 8
    acc_spec = pltpu.VMEM((acc_rows, 128), jnp.float32)

    if emit_scalar:
        out_shape = jax.ShapeDtypeStruct((1, 1), jnp.float32)
        out_spec = pl.BlockSpec((1, 1), lambda i, j: (0, 0))
    else:
        out_shape = jax.ShapeDtypeStruct((rows, 1), jnp.float32)
        out_spec = pl.BlockSpec((row_tile, 1), lambda i, j: (i, 0))

    # Explicit scoped-VMEM budget: 2x double-buffered input tile + accumulator
    # + outputs + generous headroom, capped at 48 MiB so it is always legal on
    # v7x (64 MiB physical) as well as v5e/v6e (128 MiB).
    in_tile_bytes = row_tile * patch_tile * itemsize
    vmem_limit = 2 * in_tile_bytes + acc_rows * 128 * 4 + 2 * row_tile * 4 + (8 << 20)
    vmem_limit = min(vmem_limit, 48 << 20)

    out = pl.pallas_call(
        kernel,
        out_shape=out_shape,
        grid_spec=pltpu.PrefetchScalarGridSpec(
            num_scalar_prefetch=0,
            grid=grid,
            in_specs=[pl.BlockSpec((row_tile, patch_tile), lambda i, j: (i, j))],
            out_specs=out_spec,
            scratch_shapes=[acc_spec],
        ),
        compiler_params=pltpu.CompilerParams(
            # Row axis is independent; patch axis is the accumulated reduction
            # ("arbitrary"), kept last.
            # TODO(synk): on v7x (2 TCs/chip) use pltpu.CORE_PARALLEL on the row
            # axis when grid_rows >= 2 for two concurrent DMA streams; kept as
            # "parallel" here to stay lowering-safe on single-core v5e/v6e.
            dimension_semantics=("parallel", "arbitrary"),
            vmem_limit_bytes=vmem_limit,
        ),
        cost_estimate=pl.CostEstimate(
            flops=2 * rows * p,
            transcendentals=rows,
            bytes_accessed=rows * p * itemsize + rows * 4,
        ),
    )(x)

    if emit_scalar:
        return out[0, 0]
    # Padded rows of a partial last row block are never written back to HBM,
    # so this tiny reduction only sees valid rows.
    # sum over masks, mean over batch == sum(all) / batch.
    return jnp.sum(out) / jnp.float32(b)


def _reference(masks: jax.Array, n_masks: int, beta: float = 1.5) -> jax.Array:
    # Pure-JAX reference mirroring the torch code exactly.
    m = jnp.transpose(jnp.squeeze(masks, -1), (1, 0, 2))  # (b, n, p)
    probs = m.sum(2) / m.shape[2]
    loss = 1.0 / (jnp.sin(probs * math.pi) + EPSILON_FP16) - 1.0
    loss = loss * math.sin(math.pi * (n_masks ** (-beta)))
    return loss.sum(axis=1).mean()


if __name__ == "__main__":
    # --- Test 1: typical small case (single tile -> fused in-kernel scalar) ---
    n_masks, batch, n_patches = 4, 2, 16
    key = jax.random.PRNGKey(0)
    masks = jax.random.uniform(
        key, (n_masks, batch, n_patches, 1), dtype=jnp.float32,
        minval=0.05, maxval=0.95)
    out = jax.block_until_ready(sparsity_loss(masks, n_masks=n_masks, beta=1.5))
    ref = _reference(masks, n_masks=n_masks, beta=1.5)
    assert jnp.allclose(out, ref, rtol=1e-5, atol=1e-5), (out, ref)

    # --- Test 2: exercise the tiled code paths (row chunks with padded rows,
    # patch chunks with remainder-lane masking, per-row output + JAX reduce)
    # by forcing tiny tile budgets; shapes stay small. ---
    n_masks2, batch2, n_patches2 = 3, 7, 160
    masks2 = jax.random.uniform(
        jax.random.PRNGKey(0), (n_masks2, batch2, n_patches2, 1),
        dtype=jnp.float32, minval=0.05, maxval=0.95)
    out2 = jax.block_until_ready(
        sparsity_loss(masks2, n_masks=n_masks2, beta=1.5,
                      tile_bytes=4096, patch_tile_max=128))
    ref2 = _reference(masks2, n_masks=n_masks2, beta=1.5)
    assert jnp.allclose(out2, ref2, rtol=1e-5, atol=1e-5), (out2, ref2)

    print("KERNEL_OK")
</pallas_src>

<mosaic_0001>
module attributes {stable_mosaic.version = 11 : i64} {
  func.func @_sparsity_loss_kernel(%arg0: i32, %arg1: i32, %arg2: memref<8x16xf32, #tpu.memory_space<vmem>>, %arg3: memref<1x1xf32, #tpu.memory_space<vmem>>, %arg4: memref<8x128xf32, #tpu.memory_space<vmem>>) attributes {dimension_semantics = [#tpu.dimension_semantics<parallel>, #tpu.dimension_semantics<arbitrary>], iteration_bounds = array<i64: 1, 1>, scalar_prefetch = 0 : i64, scratch_operands = 1 : i64, tpu.core_type = #tpu.core_type<tc>, window_params = [{transform_indices = @transform_0, window_bounds = array<i64: 8, 16>}, {pipeline_mode = #tpu.pipeline_mode<synchronous>, transform_indices = @transform_1, window_bounds = array<i64: 1, 1>}]} {
    %c0 = arith.constant 0 : index
    %c0_0 = arith.constant 0 : index
    %0 = vector.load %arg2[%c0, %c0_0] : memref<8x16xf32, #tpu.memory_space<vmem>>, vector<8x16xf32>
    %cst = arith.constant dense<0.000000e+00> : vector<8xf32>
    %1 = vector.multi_reduction <add>, %0, %cst [1] : vector<8x16xf32> to vector<8xf32>
    %2 = vector.shape_cast %1 : vector<8xf32> to vector<8x1xf32>
    %cst_1 = arith.constant 6.250000e-02 : f32
    %3 = vector.broadcast %cst_1 : f32 to vector<8x1xf32>
    %4 = arith.mulf %2, %3 : vector<8x1xf32>
    %cst_2 = arith.constant 3.14159274 : f32
    %5 = vector.broadcast %cst_2 : f32 to vector<8x1xf32>
    %6 = arith.mulf %4, %5 : vector<8x1xf32>
    %7 = math.sin %6 : vector<8x1xf32>
    %cst_3 = arith.constant 9.99999974E-5 : f32
    %8 = vector.broadcast %cst_3 : f32 to vector<8x1xf32>
    %9 = arith.addf %7, %8 : vector<8x1xf32>
    %cst_4 = arith.constant 1.000000e+00 : f32
    %10 = vector.broadcast %cst_4 : f32 to vector<8x1xf32>
    %11 = arith.divf %10, %9 : vector<8x1xf32>
    %cst_5 = arith.constant 1.000000e+00 : f32
    %12 = vector.broadcast %cst_5 : f32 to vector<8x1xf32>
    %13 = arith.subf %11, %12 : vector<8x1xf32>
    %cst_6 = arith.constant 0.382683426 : f32
    %14 = vector.broadcast %cst_6 : f32 to vector<8x1xf32>
    %15 = arith.mulf %13, %14 : vector<8x1xf32>
    %cst_7 = arith.constant dense<0.000000e+00> : vector<1xf32>
    %16 = vector.multi_reduction <add>, %15, %cst_7 [0] : vector<8x1xf32> to vector<1xf32>
    %17 = vector.shape_cast %16 : vector<1xf32> to vector<1x1xf32>
    %cst_8 = arith.constant 5.000000e-01 : f32
    %18 = vector.broadcast %cst_8 : f32 to vector<1x1xf32>
    %19 = arith.mulf %17, %18 : vector<1x1xf32>
    %c0_9 = arith.constant 0 : index
    %c0_10 = arith.constant 0 : index
    %20 = vector.load %arg3[%c0_9, %c0_10] : memref<1x1xf32, #tpu.memory_space<vmem>>, vector<1x1xf32>
    tpu.vector_store %arg3[%c0_9, %c0_10], %19 {strides = array<i32>} : memref<1x1xf32, #tpu.memory_space<vmem>>, vector<1x1xf32>,
    return
  }
  func.func @transform_0(%arg0: i32, %arg1: i32) -> (i32, i32) {
    %c0_i32 = arith.constant 0 : i32
    return %arg0, %arg1 : i32, i32
  }
  func.func @transform_1(%arg0: i32, %arg1: i32) -> (i32, i32) {
    %c0_i32 = arith.constant 0 : i32
    %c0_i32_0 = arith.constant 0 : i32
    %c0_i32_1 = arith.constant 0 : i32
    return %c0_i32, %c0_i32_0 : i32, i32
  }
}

</mosaic_0001>

<bundles_post_ra>
// kernel: tpu_custom_call.1
= control target key start
LH: loop header
LB: loop body
LE: loop exit
PB: predicated region body
PF: predicated region fallthrough
CT: control target
= control target key end

     0   :  { %6 = vsyncpa [#allocation4], 0  ;;  %s295_s0 = inlined_call_operand.hbm [shape: f32[8,16], index: 0, kind: input, shape index: {}]   ;;  %s296_s1 = inlined_call_operand.hbm [shape: f32[1,1], index: 1, kind: output, shape index: {}]  }
   0x1   :  { %7 = vsyncpa [#allocation5], 0  ;;  %s232_s6 = smov [#allocation3]   ;;  %s184_s10 = scalar_lea.hbm %s295_s0, 128 }
   0x2   :  { %s14_s7 = sshll.u32 %s232_s6, 4  ;;  %p185_p0 = scmp.ne.s32.totalorder %s295_s0, %s184_s10  ;;  %s15_s7 = int_to_ptr.vmem [resolvable:$true] %s14_s7 }
   0x3   :  { %p188_p1 = scmp.lt.u32.totalorder %s184_s10, %s295_s0 }
   0x5   :  { %p190_p2 = pnand %p188_p1, %p185_p0 }
   0x7   :  { %193 = shalt.err (!%p190_p2)
}
   0x8   :  { %s194_s15 = scalar_lea.vmem %s15_s7, 128  ;;  %p199_p4 = scmp.lt.s32.totalorder %s15_s7, %s15_s7 }
   0x9   :  { %p195_p3 = scmp.ne.s32.totalorder %s15_s7, %s194_s15  ;;  %p200_p5 = scmp.lt.s32.totalorder %s194_s15, %s194_s15 }
   0xb   :  { %p201_p6 = por %p200_p5, %p199_p4 }
   0xd   :  { %p202_p7 = pnand %p201_p6, %p195_p3 }
   0xf   :  { %205 = shalt.err (!%p202_p7)
}
  0x10   :  { %17 = dma.hbm_to_vmem [thread:$0]  %s295_s0, 128, %s15_s7, [#allocation4]  }
  0x11   :  { %228 = dma.done.wait [#allocation4], 128  }
  0x12   :  { %229 = vsyncadd [#allocation4], 4294967168  ;;  %vm22_vm0 = vcmask 130048   ;;  %v21_v0 = vld [vmem:[#allocation3] sm:$0xff]  ;;  %v233_v15 = vmov 683565275  }
  0x13   :  { %v23_v1 = vsel %vm22_vm0, %v21_v0, 0.0  ;;  %v234_v17 = vmov 2475754826   ;;  %v235_v20 = vmov 2131351028   ;;  %s239_s0 = smov [#allocation6]  }
  0x14   :  { %24 = vadd.xlane.f32.xlu0 %v23_v1  ;;  %v236_v23 = vmov 2102212464   ;;  %v237_v26 = vmov 920167782   ;;  %v238_v29 = vmov 1326507024  }
  0x15   :  { %s152_s18 = sshll.u32 %s239_s0, 4  ;;  %vm144_vm14 = vcmask 0   ;;  %s153_s18 = int_to_ptr.vmem [resolvable:$true] %s152_s18 }
  0x16   :  { %s206_s19 = scalar_lea.vmem %s153_s18, 16  ;;  %s210_s20 = scalar_lea.vmem %s153_s18, 32 }
  0x17   :  { %p207_p8 = scmp.ne.s32.totalorder %s153_s18, %s206_s19  ;;  %p211_p9 = scmp.lt.s32.totalorder %s153_s18, %s153_s18 }
  0x18   :  { %p212_p10 = scmp.lt.s32.totalorder %s210_s20, %s206_s19 }
  0x1a   :  { %p213_p11 = por %p212_p10, %p211_p9 }
  0x1c   :  { %p214_p12 = pnand %p213_p11, %p207_p8 }
  0xa1   :  { %v25_v2 = vpop.xlane.xlu0 %24 }
  0xa2   :  { %v26_v3 = vmul.f32 0.0625, %v25_v2 }
  0xa4   :  { %v262_v4 = vmul.f32 3.1415927, %v26_v3 }
  0xa6   :  { %v31_v5 = vand.u32 2139095040, %v262_v4  ;;  %v28_v9 = vand.u32 2147483647, %v262_v4  ;;  %vm30_vm8 = vcmp.lt.s32.totalorder %v262_v4, 0  ;;  %vm120_vm13 = vweird.f32 %v262_v4 }
  0xa8   :  { %v32_v6 = vshrl.u32 %v31_v5, 23  ;;  %v35_v12 = vand.u32 8388607, %v28_v9  ;;  %vm29_vm9 = vcmp.le.f32.partialorder %v28_v9, 0.7853982 }
  0xaa   :  { %v161_v7 = vadd.s32 4294967169, %v32_v6  ;;  %v36_v31 = vor.u32 8388608, %v35_v12 }
  0xac   :  { %v38_v8 = vadd.s32 1, %v161_v7  ;;  %v76_v45 = vshll.u32 %v36_v31, 8 }
  0xae   :  { %vm39_vm1 = vcmp.gt.s32.totalorder %v38_v8, 0 }
  0xaf   :  { %v40_v10 = vsel %vm39_vm1, %v38_v8, 0 }
  0xb0   :  { %v42_v11 = vand.u32 31, %v40_v10  ;;  %v41_v14 = vshrl.u32 %v40_v10, 5 }
  0xb2   :  { %v43_v13 = vsub.s32 32, %v42_v11  ;;  %v45_v16 = vshll.u32 %v233_v15, %v42_v11  ;;  %v48_v18 = vshll.u32 %v234_v17, %v42_v11  ;;  %v51_v22 = vshll.u32 %v235_v20, %v42_v11 }
  0xb3   :  { %v54_v25 = vshll.u32 %v236_v23, %v42_v11  ;;  %v57_v28 = vshll.u32 %v237_v26, %v42_v11  ;;  %vm60_vm2 = vcmp.lt.s32.totalorder %v41_v14, 1  ;;  %vm63_vm3 = vcmp.lt.s32.totalorder %v41_v14, 4 }
  0xb4   :  { %v46_v19 = vshrl.u32 %v234_v17, %v43_v13  ;;  %v49_v21 = vshrl.u32 %v235_v20, %v43_v13  ;;  %v52_v24 = vshrl.u32 %v236_v23, %v43_v13  ;;  %v55_v27 = vshrl.u32 %v237_v26, %v43_v13 }
  0xb5   :  { %v58_v30 = vshrl.u32 %v238_v29, %v43_v13  ;;  %v44_v40 = vshrl.u32 %v233_v15, %v43_v13  ;;  %vm62_vm4 = vcmp.lt.s32.totalorder %v41_v14, 3  ;;  %vm61_vm5 = vcmp.lt.s32.totalorder %v41_v14, 2 }
  0xb6   :  { %v47_v32 = vor.u32 %v46_v19, %v45_v16  ;;  %v50_v33 = vor.u32 %v49_v21, %v48_v18  ;;  %v53_v34 = vor.u32 %v52_v24, %v51_v22  ;;  %v56_v35 = vor.u32 %v55_v27, %v54_v25 }
  0xb7   :  { %v59_v36 = vor.u32 %v58_v30, %v57_v28 }
  0xb8   :  { %v65_v37 = vsel %vm63_vm3, %v53_v34, 2102212464  ;;  %v68_v38 = vsel %vm60_vm2, %v47_v32, %v50_v33  ;;  %v72_v39 = vsel %vm60_vm2, %v50_v33, %v53_v34  ;;  %v69_v41 = vsel %vm63_vm3, %v56_v35, 920167782 }
  0xb9   :  { %v73_v42 = vsel %vm63_vm3, %v59_v36, 1326507024  ;;  %v70_v43 = vsel %vm62_vm4, %v53_v34, %v69_v41  ;;  %v64_v46 = vsel %vm60_vm2, %v44_v40, %v47_v32  ;;  %v66_v47 = vsel %vm62_vm4, %v50_v33, %v65_v37 }
  0xba   :  { %v74_v44 = vsel %vm62_vm4, %v56_v35, %v73_v42  ;;  %v71_v48 = vsel %vm61_vm5, %v68_v38, %v70_v43  ;;  %v67_v54 = vsel %vm61_vm5, %v64_v46, %v66_v47 }
  0xbb   :  { %v75_v49 = vsel %vm61_vm5, %v72_v39, %v74_v44  ;;  %v271_v52 = vmul.u32.u64.low %v76_v45, %v71_v48  ;;  %v272_v53 = vmul.u32.u64.high %v76_v45, %v71_v48, %v271_v52  ;;  %v83_v56 = vmul.u32 %v76_v45, %v67_v54 }
  0xbc   :  { %v268_v50 = vmul.u32.u64.low %v76_v45, %v75_v49  ;;  %v269_v51 = vmul.u32.u64.high %v76_v45, %v75_v49, %v268_v50 }
  0xbd   :  { %v86_v55 = vadd.s32 1, %v272_v53 }
  0xbe   :  { %vm85_vm6 = vc.u32 %v269_v51, %v271_v52  ;;  %v84_v5 = vadd.s32 %v271_v52, %v269_v51 }
  0xbf   :  { %v87_v57 = vsel %vm85_vm6, %v86_v55, %v272_v53 }
  0xc0   :  { %v88_v58 = vadd.s32 %v87_v57, %v83_v56 }
  0xc2   :  { %v89_v59 = vadd.s32 536870912, %v88_v58 }
  0xc4   :  { %v90_v60 = vshrl.u32 %v89_v59, 30 }
  0xc6   :  { %v91_v61 = vshll.u32 %v90_v60, 30  ;;  %v114_v18 = vsub.s32 4, %v90_v60 }
  0xc8   :  { %v92_v62 = vsub.s32 %v88_v58, %v91_v61  ;;  %v115_v21 = vsel %vm30_vm8, %v114_v18, %v90_v60 }
  0xc9   :  { %v117_v23 = vsel %vm29_vm9, 0, %v115_v21 }
  0xca   :  { %v94_v63 = vsub.s32 0, %v92_v62  ;;  %v121_v24 = vadd.s32 3, %v117_v23 }
  0xcc   :  { %v162_v0 = vmin.u32 %v94_v63, %v92_v62  ;;  %v122_v25 = vand.u32 3, %v121_v24 }
  0xce   :  { %v96_v1 = vclz %v162_v0  ;;  %vm127_vm10 = vcmp.eq.s32.totalorder %v122_v25, 2  ;;  %vm124_vm11 = vcmp.eq.s32.totalorder %v122_v25, 0  ;;  %vm123_vm12 = vcmp.lt.s32.totalorder %v122_v25, 2 }
  0xd0   :  { %v163_v2 = vadd.s32 4294967294, %v96_v1 }
  0xd2   :  { %vm164_vm7 = vcmp.lt.s32.totalorder %v163_v2, 0 }
  0xd3   :  { %v99_v3 = vsel %vm164_vm7, 0, %v163_v2 }
  0xd4   :  { %v100_v6 = vsub.s32 32, %v99_v3  ;;  %v104_v7 = vsub.s32 4294967266, %v99_v3  ;;  %v101_v8 = vshll.u32 %v92_v62, %v99_v3 }
  0xd6   :  { %v102_v10 = vshrl.u32 %v84_v5, %v100_v6  ;;  %v105_v11 = vadd.s32 127, %v104_v7 }
  0xd8   :  { %v103_v12 = vor.u32 %v102_v10, %v101_v8  ;;  %v106_v13 = vshll.u32 %v105_v11, 23 }
  0xda   :  { %v107_v14 = vor.u32 4788187, %v106_v13  ;;  %v110_v16 = vcvt.s32.f32 %v103_v12 }
  0xdc   :  { %v108_v15 = vand.u32 2147483647, %v107_v14 }
  0xde   :  { %v111_v17 = vmul.f32 %v110_v16, %v108_v15 }
  0xe0   :  { %v112_v19 = vxor.u32 2147483648, %v111_v17 }
  0xe2   :  { %v113_v20 = vsel %vm30_vm8, %v112_v19, %v111_v17 }
  0xe3   :  { %v116_v22 = vsel %vm29_vm9, %v262_v4, %v113_v20 }
  0xe4   :  { %178 = vcosq.f32 %v116_v22 }
  0xe5   :  { %180 = vsinq.f32 %v116_v22 }
  0xee   :  { %v179_v26 = vpop.eup %178 }
  0xef   :  { %v181_v27 = vpop.eup %180  ;;  %v128_v28 = vxor.u32 2147483648, %v179_v26 }
  0xf0   :  { %v125_v29 = vxor.u32 2147483648, %v181_v27 }
  0xf1   :  { %v129_v30 = vsel %vm127_vm10, %v128_v28, %v181_v27 }
  0xf2   :  { %v126_v31 = vsel %vm124_vm11, %v179_v26, %v125_v29 }
  0xf3   :  { %v130_v9 = vsel %vm123_vm12, %v126_v31, %v129_v30 }
  0xf4   :  { %v131_v32 = vsel %vm120_vm13, nan, %v130_v9 }
  0xf5   :  { %v132_v33 = vadd.f32 0.0001, %v131_v32 }
  0xf7   :  { %182 = vrcp.f32 %v132_v33 }
 0x101   :  { %v183_v34 = vpop.eup %182 }
 0x102   :  { %v165_v35 = vadd.f32 -1.0, %v183_v34 }
 0x104   :  { %v136_v36 = vmul.f32 0.38268343, %v165_v35 }
 0x106   :  { %v137_v37 = vrot.slane %v136_v36, 4 }
 0x108   :  { %v138_v38 = vadd.f32 %v137_v37, %v136_v36 }
 0x10a   :  { %v139_v39 = vrot.slane %v138_v38, 2 }
 0x10c   :  { %v140_v40 = vadd.f32 %v139_v39, %v138_v38 }
 0x10e   :  { %v141_v41 = vrot.slane %v140_v40, 1 }
 0x110   :  { %v142_v42 = vadd.f32 %v141_v41, %v140_v40 }
 0x112   :  { %v143_v43 = vmul.f32 0.5, %v142_v42 }
 0x114   :  { %145 = vst.msk [vmem:[#allocation6] sm:$0x1] %vm144_vm14, %v143_v43 }
 0x115   :  { %217 = shalt.err (!%p214_p12)
}
 0x116   :  { %s218_s23 = scalar_lea.hbm %s296_s1, 16 }
 0x117   :  { %p219_p13 = scmp.ne.s32.totalorder %s296_s1, %s218_s23  ;;  %p222_p0 = scmp.lt.u32.totalorder %s218_s23, %s296_s1 }
 0x119   :  { %p224_p1 = pnand %p222_p0, %p219_p13 }
 0x11b   :  { %227 = shalt.err (!%p224_p1)
}
 0x11c   :  { %155 = dma.vmem_to_hbm [thread:$0]  %s153_s18, 16, %s296_s1, [#allocation5]  }
 0x11d   :  { %230 = dma.done.wait [#allocation5], 16  }
 0x11e   :  { %231 = vsyncadd [#allocation5], 4294967280 }
 0x11f   :  { %159 = vsyncpa [#allocation4], 1 }
 0x120   :  { %160 = vsyncpa [#allocation5], 1 }

</bundles_post_ra>
